<compile_context>
chip_gen: v5e
topology: v5e:2x2
jax: 0.10.0
libtpu: 0.0.40
codegen_flags: <defaults>
</compile_context>

<pallas_src>
import functools

import numpy as np
import jax
import jax.numpy as jnp
from jax import lax
from jax.experimental import pallas as pl
from jax.experimental.pallas import tpu as pltpu

# ---- synthetic config (small, consistent with the module's __init__) --------
D_MODEL = 64     # CONTEXT_HIDDEN_DIM
N_HEAD = 2       # TRANSFORMER.NUM_HEAD
D_K = 32         # TRANSFORMER.KEY_DIM
D_V = 32         # TRANSFORMER.VAL_DIM
D_INNER = 128    # TRANSFORMER.INNER_DIM
LN_EPS = 1e-5
TEMP = float(D_K) ** 0.5

# ---- packed parameter slab layout (all rows 128 lanes wide) -----------------
_ROW_WQ = 0          # rows   0.. 63 : [ wq/sqrt(dk) (64x64) | wfc (64x64) ]
_ROW_WKV = 64        # rows  64..127 : [ wk (64x64) | wv  (64x64) ]
_ROW_W1 = 128        # rows 128..191 : w1 (64x128)
_ROW_W2 = 192        # rows 192..319 : w2 (128x64) in lanes 0:64
_ROW_BIAS = 320      # rows 320..327 : bias / LayerNorm block (see pack_params)
PARAM_ROWS = 328


def _layer_norm(x, gamma, beta):
    mu = jnp.mean(x, axis=-1, keepdims=True)
    var = jnp.mean((x - mu) ** 2, axis=-1, keepdims=True)
    return (x - mu) * lax.rsqrt(var + LN_EPS) * gamma + beta


def _bf16(v):
    return v.astype(jnp.bfloat16)


# -------------------------- Pallas kernel -----------------------------------
def cross_attention_kernel(off_ref,      # scalar prefetch: cumulative offsets (SMEM)
                           x_ref,        # (TQ, 64) visual queries / residual tile
                           t_ref,        # (R, 64) textual feats (full, resident)
                           p_ref,        # (328, 128) packed parameter slab
                           out_ref,      # (TQ, 64)
                           *, bsz):
    TQ = x_ref.shape[0]
    RK = t_ref.shape[0]
    row0 = pl.program_id(0) * TQ

    x = x_ref[...]                          # (TQ, 64) f32
    t = t_ref[...]                          # (RK, 64) f32

    # ---- packed weights (bf16 MXU operands; biases / LN params stay f32) ----
    wq = _bf16(p_ref[_ROW_WQ:_ROW_WQ + D_MODEL, 0:D_MODEL])        # pre-scaled by 1/sqrt(dk)
    wkv = _bf16(p_ref[_ROW_WKV:_ROW_WKV + D_MODEL, :])             # (64, 128) = [wk | wv]
    w1 = _bf16(p_ref[_ROW_W1:_ROW_W1 + D_MODEL, :])                # (64, 128)
    w2 = _bf16(p_ref[_ROW_W2:_ROW_W2 + D_INNER, 0:D_MODEL])        # (128, 64)
    bias = p_ref[_ROW_BIAS:_ROW_BIAS + 8, :]                       # (8, 128)
    bq = bias[0:1, 0:D_MODEL]           # pre-scaled by 1/sqrt(dk)
    bfc = bias[0:1, D_MODEL:2 * D_MODEL]
    bkv = bias[1:2, :]
    b1 = bias[2:3, :]
    b2 = bias[3:4, 0:D_MODEL]
    g1 = bias[4:5, 0:D_MODEL]
    g2 = bias[4:5, D_MODEL:2 * D_MODEL]
    be1 = bias[5:6, 0:D_MODEL]
    be2 = bias[5:6, D_MODEL:2 * D_MODEL]

    # ---- fused projections: Q from this query tile, [K|V] from all keys -----
    # (K/V projection is tiny (RK x 64 x 128); recomputed per step so every
    #  grid step stays independent and the row axis remains truly "parallel".)
    q = jnp.dot(_bf16(x), wq, preferred_element_type=jnp.float32) + bq     # (TQ, 64)
    kv = jnp.dot(_bf16(t), wkv, preferred_element_type=jnp.float32) + bkv  # (RK, 128)
    qb = _bf16(q)
    kvb = _bf16(kv)

    # ---- segment mask from prefetched cumulative offsets (hoisted, additive)
    row = row0 + lax.broadcasted_iota(jnp.int32, (TQ, 1), 0)
    col = lax.broadcasted_iota(jnp.int32, (1, RK), 1)
    seg_r = jnp.zeros((TQ, 1), jnp.int32)
    seg_c = jnp.zeros((1, RK), jnp.int32)
    for b in range(1, bsz + 1):             # bsz is static & small -> unrolled
        boundary = off_ref[b]
        seg_r = seg_r + (row >= boundary).astype(jnp.int32)
        seg_c = seg_c + (col >= boundary).astype(jnp.int32)
    add_mask = jnp.where(seg_r == seg_c, 0.0, -1e30).astype(jnp.float32)   # (TQ, RK)
    non_pad = (row < off_ref[bsz]).astype(jnp.float32)                     # (TQ, 1)

    # ---- multi-head cross attention (heads folded into the fc projection) ---
    o_proj = jnp.zeros((TQ, D_MODEL), jnp.float32)
    for h in range(N_HEAD):                 # static, fully unrolled
        qh = qb[:, h * D_K:(h + 1) * D_K]                                   # (TQ, 32)
        kh = kvb[:, h * D_K:(h + 1) * D_K]                                  # (RK, 32)
        vh = kvb[:, N_HEAD * D_K + h * D_V:N_HEAD * D_K + (h + 1) * D_V]    # (RK, 32)
        s = lax.dot_general(qh, kh, (((1,), (1,)), ((), ())),
                            preferred_element_type=jnp.float32)             # (TQ, RK)
        s = s + add_mask
        s = s - jnp.max(s, axis=-1, keepdims=True)
        p = jnp.exp(s)
        p = p * pl.reciprocal(jnp.sum(p, axis=-1, keepdims=True), approx=False)
        head = jnp.dot(_bf16(p), vh, preferred_element_type=jnp.float32)    # (TQ, 32)
        wfc_h = _bf16(p_ref[_ROW_WQ + h * D_V:_ROW_WQ + (h + 1) * D_V,
                            D_MODEL:2 * D_MODEL])                           # (32, 64)
        o_proj = o_proj + jnp.dot(_bf16(head), wfc_h,
                                  preferred_element_type=jnp.float32)

    # output proj bias + residual + LayerNorm, zero padded rows (dropout = id)
    o = _layer_norm(o_proj + bfc + x, g1, be1) * non_pad

    # position-wise FFN (Conv1d k=1) + residual + LayerNorm, zero padded rows
    hdn = jnp.maximum(jnp.dot(_bf16(o), w1,
                              preferred_element_type=jnp.float32) + b1, 0.0)
    f = jnp.dot(_bf16(hdn), w2, preferred_element_type=jnp.float32) + b2
    o2 = _layer_norm(f + o, g2, be2) * non_pad

    out_ref[...] = o2


# ------------------------------ glue -----------------------------------------
def default_query_tile():
    """TQ=128 on v5e (128-deep MXU / 16 MiB scoped VMEM), 256 on v6e/v7x."""
    try:
        kind = jax.devices()[0].device_kind.lower()
    except Exception:
        return 256
    return 128 if "v5" in kind else 256


def make_params(key):
    ks = jax.random.split(key, 12)
    std_qk = (2.0 / (D_MODEL + D_K)) ** 0.5
    std_v = (2.0 / (D_MODEL + D_V)) ** 0.5
    xav_fc = (2.0 / (N_HEAD * D_V + D_MODEL)) ** 0.5
    return {
        "wq":  jax.random.normal(ks[0], (D_MODEL, N_HEAD * D_K), jnp.float32) * std_qk,
        "bq":  jax.random.normal(ks[1], (1, N_HEAD * D_K), jnp.float32) * 0.02,
        "wk":  jax.random.normal(ks[2], (D_MODEL, N_HEAD * D_K), jnp.float32) * std_qk,
        "bk":  jax.random.normal(ks[3], (1, N_HEAD * D_K), jnp.float32) * 0.02,
        "wv":  jax.random.normal(ks[4], (D_MODEL, N_HEAD * D_V), jnp.float32) * std_v,
        "bv":  jax.random.normal(ks[5], (1, N_HEAD * D_V), jnp.float32) * 0.02,
        "wfc": jax.random.normal(ks[6], (N_HEAD * D_V, D_MODEL), jnp.float32) * xav_fc,
        "bfc": jax.random.normal(ks[7], (1, D_MODEL), jnp.float32) * 0.02,
        "g1":  jnp.ones((1, D_MODEL), jnp.float32),
        "be1": jnp.zeros((1, D_MODEL), jnp.float32),
        "w1":  jax.random.normal(ks[8], (D_MODEL, D_INNER), jnp.float32) * 0.05,
        "b1":  jax.random.normal(ks[9], (1, D_INNER), jnp.float32) * 0.02,
        "w2":  jax.random.normal(ks[10], (D_INNER, D_MODEL), jnp.float32) * 0.05,
        "b2":  jax.random.normal(ks[11], (1, D_MODEL), jnp.float32) * 0.02,
        "g2":  jnp.ones((1, D_MODEL), jnp.float32),
        "be2": jnp.zeros((1, D_MODEL), jnp.float32),
    }


def pack_params(P):
    """Pack all 18 small parameter tensors into one (328, 128) f32 slab.

    1/sqrt(d_k) is folded into wq / bq here, removing the per-element score
    scale inside the kernel.
    """
    Pn = {k: np.asarray(v, np.float32) for k, v in P.items()}
    inv_temp = 1.0 / TEMP
    slab = np.zeros((PARAM_ROWS, 2 * D_MODEL), np.float32)
    slab[_ROW_WQ:_ROW_WQ + D_MODEL, 0:D_MODEL] = Pn["wq"] * inv_temp
    slab[_ROW_WQ:_ROW_WQ + D_MODEL, D_MODEL:] = Pn["wfc"]
    slab[_ROW_WKV:_ROW_WKV + D_MODEL, 0:D_MODEL] = Pn["wk"]
    slab[_ROW_WKV:_ROW_WKV + D_MODEL, D_MODEL:] = Pn["wv"]
    slab[_ROW_W1:_ROW_W1 + D_MODEL, :] = Pn["w1"]
    slab[_ROW_W2:_ROW_W2 + D_INNER, 0:D_MODEL] = Pn["w2"]
    slab[_ROW_BIAS + 0, 0:D_MODEL] = Pn["bq"][0] * inv_temp
    slab[_ROW_BIAS + 0, D_MODEL:] = Pn["bfc"][0]
    slab[_ROW_BIAS + 1, 0:D_MODEL] = Pn["bk"][0]
    slab[_ROW_BIAS + 1, D_MODEL:] = Pn["bv"][0]
    slab[_ROW_BIAS + 2, :] = Pn["b1"][0]
    slab[_ROW_BIAS + 3, 0:D_MODEL] = Pn["b2"][0]
    slab[_ROW_BIAS + 4, 0:D_MODEL] = Pn["g1"][0]
    slab[_ROW_BIAS + 4, D_MODEL:] = Pn["g2"][0]
    slab[_ROW_BIAS + 5, 0:D_MODEL] = Pn["be1"][0]
    slab[_ROW_BIAS + 5, D_MODEL:] = Pn["be2"][0]
    return jnp.asarray(slab)


@functools.partial(jax.jit, static_argnames=("num_objs", "tq"))
def cross_attention_cell(x, textual_feats, param_slab, *, num_objs, tq=256):
    """Pallas-backed Cross_Attention_Cell.forward (eval mode)."""
    num_objs = tuple(int(n) for n in num_objs)
    bsz = len(num_objs)
    total = sum(num_objs)

    tq = max(8, (int(tq) // 8) * 8)
    r8 = max(8, -(-total // 8) * 8)          # rows rounded to f32 sublane tile (8)
    tq_eff = min(tq, r8)                      # query tile (multiple of 8)
    R = -(-total // tq_eff) * tq_eff          # padded rows = grid * tq_eff
    grid = R // tq_eff

    offsets = np.zeros((bsz + 1,), np.int32)
    offsets[1:] = np.cumsum(num_objs)
    off = jnp.asarray(offsets)

    # minimal row padding only (no wrapper-side concat of the two feature slabs)
    pad = R - total
    xp = jnp.pad(x, ((0, pad), (0, 0)))
    tp = jnp.pad(textual_feats, ((0, pad), (0, 0)))

    kernel = functools.partial(cross_attention_kernel, bsz=bsz)
    grid_spec = pltpu.PrefetchScalarGridSpec(
        num_scalar_prefetch=1,
        grid=(grid,),
        in_specs=[
            # query tile marches down the row axis
            pl.BlockSpec((tq_eff, D_MODEL), lambda i, off: (i, 0)),
            # full key slab, constant block index -> fetched once, kept resident
            pl.BlockSpec((R, D_MODEL), lambda i, off: (0, 0)),
            # packed parameters, constant block index
            pl.BlockSpec((PARAM_ROWS, 2 * D_MODEL), lambda i, off: (0, 0)),
        ],
        out_specs=pl.BlockSpec((tq_eff, D_MODEL), lambda i, off: (i, 0)),
    )
    out = pl.pallas_call(
        kernel,
        out_shape=jax.ShapeDtypeStruct((R, D_MODEL), jnp.float32),
        grid_spec=grid_spec,
        compiler_params=pltpu.CompilerParams(
            dimension_semantics=("parallel",),          # shards across TCs on v7x
            vmem_limit_bytes=48 * 1024 * 1024),         # within v7x 64 MiB physical
    )(off, xp, tp, param_slab)
    return out[:total]


# -------------------------- pure-JAX reference (f32, mirrors PyTorch) --------
def _pad_split(flat, num_objs, pad_len):
    chunks, offp = [], 0
    for n in num_objs:
        c = flat[offp:offp + n]
        chunks.append(jnp.pad(c, ((0, pad_len - n), (0, 0))))
        offp += n
    return jnp.stack(chunks, axis=0)


def reference(x, textual_feats, num_objs, P):
    bsz, pad_len = len(num_objs), max(num_objs)
    xp = _pad_split(x, num_objs, pad_len)
    tp = _pad_split(textual_feats, num_objs, pad_len)
    n_arr = jnp.asarray(num_objs)[:, None]
    col = jnp.arange(pad_len)[None, :]
    key_pad = col >= n_arr
    non_pad = (col < n_arr).astype(jnp.float32)[..., None]

    q = (xp @ P["wq"] + P["bq"]).reshape(bsz, pad_len, N_HEAD, D_K).transpose(0, 2, 1, 3)
    k = (tp @ P["wk"] + P["bk"]).reshape(bsz, pad_len, N_HEAD, D_K).transpose(0, 2, 1, 3)
    v = (tp @ P["wv"] + P["bv"]).reshape(bsz, pad_len, N_HEAD, D_V).transpose(0, 2, 1, 3)
    attn = jnp.einsum("bhqd,bhkd->bhqk", q, k) / TEMP
    attn = jnp.where(key_pad[:, None, None, :], -jnp.inf, attn)
    attn = jax.nn.softmax(attn, axis=-1)
    o = jnp.einsum("bhqk,bhkd->bhqd", attn, v).transpose(0, 2, 1, 3)
    o = o.reshape(bsz, pad_len, N_HEAD * D_V) @ P["wfc"] + P["bfc"]
    o = _layer_norm(o + xp, P["g1"], P["be1"]) * non_pad
    h = jax.nn.relu(o @ P["w1"] + P["b1"])
    f = h @ P["w2"] + P["b2"]
    o2 = _layer_norm(f + o, P["g2"], P["be2"]) * non_pad
    return jnp.concatenate([o2[b, :num_objs[b]] for b in range(bsz)], axis=0)


def _check(out, ref):
    # Tolerance absorbs bf16 MXU-operand rounding (review-endorsed) propagated
    # through two LayerNorms; the softmax normalization itself is exact.
    assert jnp.allclose(out, ref, atol=5e-2, rtol=5e-2), \
        float(jnp.max(jnp.abs(out - ref)))


# ------------------------------- main -----------------------------------------
if __name__ == "__main__":
    key = jax.random.PRNGKey(0)
    k_param, k_x, k_t, k_x2, k_t2 = jax.random.split(key, 5)

    params = make_params(k_param)
    slab = pack_params(params)
    tq = default_query_tile()

    # case 1: tiny per-image object counts (typical relation-head sizes)
    num_objs = (5, 8)
    total = sum(num_objs)
    x = jax.random.normal(k_x, (total, D_MODEL), jnp.float32)              # visual feats
    textual_feats = jax.random.normal(k_t, (total, D_MODEL), jnp.float32)  # textual feats
    out = cross_attention_cell(x, textual_feats, slab, num_objs=num_objs, tq=tq)
    out = jax.block_until_ready(out)
    ref = jax.block_until_ready(reference(x, textual_feats, list(num_objs), params))
    assert out.shape == (total, D_MODEL), out.shape
    _check(out, ref)

    # case 2: larger batch -> exercises the multi-step query tiling / parallel grid
    num_objs2 = (150, 170, 190)
    total2 = sum(num_objs2)
    x2 = jax.random.normal(k_x2, (total2, D_MODEL), jnp.float32)
    t2 = jax.random.normal(k_t2, (total2, D_MODEL), jnp.float32)
    out2 = cross_attention_cell(x2, t2, slab, num_objs=num_objs2, tq=tq)
    out2 = jax.block_until_ready(out2)
    ref2 = jax.block_until_ready(reference(x2, t2, list(num_objs2), params))
    assert out2.shape == (total2, D_MODEL), out2.shape
    _check(out2, ref2)

    print("KERNEL_OK")
</pallas_src>

<mosaic_0001>
module attributes {stable_mosaic.version = 11 : i64} {
  func.func @cross_attention_kernel(%arg0: i32, %arg1: memref<3xi32, #tpu.memory_space<smem>>, %arg2: memref<16x64xf32, #tpu.memory_space<vmem>>, %arg3: memref<16x64xf32, #tpu.memory_space<vmem>>, %arg4: memref<328x128xf32, #tpu.memory_space<vmem>>, %arg5: memref<16x64xf32, #tpu.memory_space<vmem>>) attributes {dimension_semantics = [#tpu.dimension_semantics<parallel>], iteration_bounds = array<i64: 1>, scalar_prefetch = 1 : i64, scratch_operands = 0 : i64, tpu.core_type = #tpu.core_type<tc>, window_params = [{transform_indices = @transform_0, window_bounds = array<i64: 16, 64>}, {pipeline_mode = #tpu.pipeline_mode<synchronous>, transform_indices = @transform_1, window_bounds = array<i64: 16, 64>}, {pipeline_mode = #tpu.pipeline_mode<synchronous>, transform_indices = @transform_2, window_bounds = array<i64: 328, 128>}, {transform_indices = @transform_3, window_bounds = array<i64: 16, 64>}]} {
    %c16_i32 = arith.constant 16 : i32
    %0 = arith.muli %arg0, %c16_i32 : i32
    %c0 = arith.constant 0 : index
    %c0_0 = arith.constant 0 : index
    %1 = vector.load %arg2[%c0, %c0_0] : memref<16x64xf32, #tpu.memory_space<vmem>>, vector<16x64xf32>
    %c0_1 = arith.constant 0 : index
    %c0_2 = arith.constant 0 : index
    %2 = vector.load %arg3[%c0_1, %c0_2] : memref<16x64xf32, #tpu.memory_space<vmem>>, vector<16x64xf32>
    %c0_3 = arith.constant 0 : index
    %c0_4 = arith.constant 0 : index
    %3 = vector.load %arg4[%c0_3, %c0_4] : memref<328x128xf32, #tpu.memory_space<vmem>>, vector<64x64xf32>
    %4 = arith.truncf %3 : vector<64x64xf32> to vector<64x64xbf16>
    %c64 = arith.constant 64 : index
    %c0_5 = arith.constant 0 : index
    %5 = vector.load %arg4[%c64, %c0_5] : memref<328x128xf32, #tpu.memory_space<vmem>>, vector<64x128xf32>
    %6 = arith.truncf %5 : vector<64x128xf32> to vector<64x128xbf16>
    %c128 = arith.constant 128 : index
    %c0_6 = arith.constant 0 : index
    %7 = vector.load %arg4[%c128, %c0_6] : memref<328x128xf32, #tpu.memory_space<vmem>>, vector<64x128xf32>
    %8 = arith.truncf %7 : vector<64x128xf32> to vector<64x128xbf16>
    %c192 = arith.constant 192 : index
    %c0_7 = arith.constant 0 : index
    %9 = vector.load %arg4[%c192, %c0_7] : memref<328x128xf32, #tpu.memory_space<vmem>>, vector<128x64xf32>
    %10 = arith.truncf %9 : vector<128x64xf32> to vector<128x64xbf16>
    %c320 = arith.constant 320 : index
    %c0_8 = arith.constant 0 : index
    %11 = vector.load %arg4[%c320, %c0_8] : memref<328x128xf32, #tpu.memory_space<vmem>>, vector<8x128xf32>
    %12 = vector.extract_strided_slice %11 {offsets = [0, 0], sizes = [1, 64], strides = [1, 1]} : vector<8x128xf32> to vector<1x64xf32>
    %13 = vector.extract_strided_slice %11 {offsets = [0, 64], sizes = [1, 64], strides = [1, 1]} : vector<8x128xf32> to vector<1x64xf32>
    %14 = vector.extract_strided_slice %11 {offsets = [1, 0], sizes = [1, 128], strides = [1, 1]} : vector<8x128xf32> to vector<1x128xf32>
    %15 = vector.extract_strided_slice %11 {offsets = [2, 0], sizes = [1, 128], strides = [1, 1]} : vector<8x128xf32> to vector<1x128xf32>
    %16 = vector.extract_strided_slice %11 {offsets = [3, 0], sizes = [1, 64], strides = [1, 1]} : vector<8x128xf32> to vector<1x64xf32>
    %17 = vector.extract_strided_slice %11 {offsets = [4, 0], sizes = [1, 64], strides = [1, 1]} : vector<8x128xf32> to vector<1x64xf32>
    %18 = vector.extract_strided_slice %11 {offsets = [4, 64], sizes = [1, 64], strides = [1, 1]} : vector<8x128xf32> to vector<1x64xf32>
    %19 = vector.extract_strided_slice %11 {offsets = [5, 0], sizes = [1, 64], strides = [1, 1]} : vector<8x128xf32> to vector<1x64xf32>
    %20 = vector.extract_strided_slice %11 {offsets = [5, 64], sizes = [1, 64], strides = [1, 1]} : vector<8x128xf32> to vector<1x64xf32>
    %21 = arith.truncf %1 : vector<16x64xf32> to vector<16x64xbf16>
    %cst = arith.constant dense<0.000000e+00> : vector<16x64xf32>
    %22 = tpu.matmul %21, %4, %cst {dimension_numbers = #tpu.dot_dimension_numbers<[1], [0], [0], [1], [0, 0, 1, 1], [], []>} : vector<16x64xbf16>, vector<64x64xbf16>, vector<16x64xf32> -> vector<16x64xf32>
    %23 = vector.broadcast %12 : vector<1x64xf32> to vector<16x64xf32>
    %24 = arith.addf %22, %23 : vector<16x64xf32>
    %25 = arith.truncf %2 : vector<16x64xf32> to vector<16x64xbf16>
    %cst_9 = arith.constant dense<0.000000e+00> : vector<16x128xf32>
    %26 = tpu.matmul %25, %6, %cst_9 {dimension_numbers = #tpu.dot_dimension_numbers<[1], [0], [0], [1], [0, 0, 1, 1], [], []>} : vector<16x64xbf16>, vector<64x128xbf16>, vector<16x128xf32> -> vector<16x128xf32>
    %27 = vector.broadcast %14 : vector<1x128xf32> to vector<16x128xf32>
    %28 = arith.addf %26, %27 : vector<16x128xf32>
    %29 = arith.truncf %24 : vector<16x64xf32> to vector<16x64xbf16>
    %30 = arith.truncf %28 : vector<16x128xf32> to vector<16x128xbf16>
    %31 = tpu.iota {dimensions = array<i32: 0>} : vector<16x1xi32>
    %32 = vector.broadcast %0 : i32 to vector<16x1xi32>
    %33 = arith.addi %32, %31 : vector<16x1xi32>
    %34 = tpu.iota {dimensions = array<i32: 1>} : vector<1x16xi32>
    %c0_i32 = arith.constant 0 : i32
    %35 = vector.broadcast %c0_i32 : i32 to vector<16x1xi32>
    %c0_i32_10 = arith.constant 0 : i32
    %36 = vector.broadcast %c0_i32_10 : i32 to vector<1x16xi32>
    %c1 = arith.constant 1 : index
    %37 = memref.load %arg1[%c1] : memref<3xi32, #tpu.memory_space<smem>>
    %38 = vector.broadcast %37 : i32 to vector<16x1xi32>
    %39 = arith.cmpi sge, %33, %38 : vector<16x1xi32>
    %40 = arith.extui %39 : vector<16x1xi1> to vector<16x1xi32>
    %41 = arith.addi %35, %40 : vector<16x1xi32>
    %42 = vector.broadcast %37 : i32 to vector<1x16xi32>
    %43 = arith.cmpi sge, %34, %42 : vector<1x16xi32>
    %44 = arith.extui %43 : vector<1x16xi1> to vector<1x16xi32>
    %45 = arith.addi %36, %44 : vector<1x16xi32>
    %c2 = arith.constant 2 : index
    %46 = memref.load %arg1[%c2] : memref<3xi32, #tpu.memory_space<smem>>
    %47 = vector.broadcast %46 : i32 to vector<16x1xi32>
    %48 = arith.cmpi sge, %33, %47 : vector<16x1xi32>
    %49 = arith.extui %48 : vector<16x1xi1> to vector<16x1xi32>
    %50 = arith.addi %41, %49 : vector<16x1xi32>
    %51 = vector.broadcast %46 : i32 to vector<1x16xi32>
    %52 = arith.cmpi sge, %34, %51 : vector<1x16xi32>
    %53 = arith.extui %52 : vector<1x16xi1> to vector<1x16xi32>
    %54 = arith.addi %45, %53 : vector<1x16xi32>
    %55 = vector.broadcast %50 : vector<16x1xi32> to vector<16x16xi32>
    %56 = vector.broadcast %54 : vector<1x16xi32> to vector<16x16xi32>
    %57 = arith.cmpi eq, %55, %56 : vector<16x16xi32>
    %cst_11 = arith.constant 0.000000e+00 : f32
    %cst_12 = arith.constant -1.000000e+30 : f32
    %58 = vector.broadcast %cst_11 : f32 to vector<16x16xf32>
    %59 = vector.broadcast %cst_12 : f32 to vector<16x16xf32>
    %60 = arith.select %57, %58, %59 : vector<16x16xi1>, vector<16x16xf32>
    %c2_13 = arith.constant 2 : index
    %61 = memref.load %arg1[%c2_13] : memref<3xi32, #tpu.memory_space<smem>>
    %62 = vector.broadcast %61 : i32 to vector<16x1xi32>
    %63 = arith.cmpi slt, %33, %62 : vector<16x1xi32>
    %64 = arith.extui %63 : vector<16x1xi1> to vector<16x1xi32>
    %65 = arith.sitofp %64 : vector<16x1xi32> to vector<16x1xf32>
    %cst_14 = arith.constant 0.000000e+00 : f32
    %66 = vector.broadcast %cst_14 : f32 to vector<16x64xf32>
    %67 = vector.extract_strided_slice %29 {offsets = [0, 0], sizes = [16, 32], strides = [1, 1]} : vector<16x64xbf16> to vector<16x32xbf16>
    %68 = vector.extract_strided_slice %30 {offsets = [0, 0], sizes = [16, 32], strides = [1, 1]} : vector<16x128xbf16> to vector<16x32xbf16>
    %69 = vector.extract_strided_slice %30 {offsets = [0, 64], sizes = [16, 32], strides = [1, 1]} : vector<16x128xbf16> to vector<16x32xbf16>
    %cst_15 = arith.constant dense<0.000000e+00> : vector<16x16xf32>
    %70 = tpu.matmul %67, %68, %cst_15 {dimension_numbers = #tpu.dot_dimension_numbers<[1], [1], [0], [0], [0, 0, 1, 0], [], []>} : vector<16x32xbf16>, vector<16x32xbf16>, vector<16x16xf32> -> vector<16x16xf32>
    %71 = arith.addf %70, %60 : vector<16x16xf32>
    %cst_16 = arith.constant dense<0xFF800000> : vector<16xf32>
    %72 = vector.multi_reduction <maximumf>, %71, %cst_16 [1] : vector<16x16xf32> to vector<16xf32>
    %73 = vector.shape_cast %72 : vector<16xf32> to vector<16x1xf32>
    %74 = vector.broadcast %73 : vector<16x1xf32> to vector<16x16xf32>
    %75 = arith.subf %71, %74 : vector<16x16xf32>
    %76 = math.exp %75 : vector<16x16xf32>
    %cst_17 = arith.constant dense<0.000000e+00> : vector<16xf32>
    %77 = vector.multi_reduction <add>, %76, %cst_17 [1] : vector<16x16xf32> to vector<16xf32>
    %78 = vector.shape_cast %77 : vector<16xf32> to vector<16x1xf32>
    %79 = tpu.reciprocal %78 : vector<16x1xf32> -> vector<16x1xf32>
    %80 = vector.broadcast %79 : vector<16x1xf32> to vector<16x16xf32>
    %81 = arith.mulf %76, %80 : vector<16x16xf32>
    %82 = arith.truncf %81 : vector<16x16xf32> to vector<16x16xbf16>
    %cst_18 = arith.constant dense<0.000000e+00> : vector<16x32xf32>
    %83 = tpu.matmul %82, %69, %cst_18 {dimension_numbers = #tpu.dot_dimension_numbers<[1], [0], [0], [1], [0, 0, 1, 1], [], []>} : vector<16x16xbf16>, vector<16x32xbf16>, vector<16x32xf32> -> vector<16x32xf32>
    %c0_19 = arith.constant 0 : index
    %c64_20 = arith.constant 64 : index
    %84 = vector.load %arg4[%c0_19, %c64_20] : memref<328x128xf32, #tpu.memory_space<vmem>>, vector<32x64xf32>
    %85 = arith.truncf %84 : vector<32x64xf32> to vector<32x64xbf16>
    %86 = arith.truncf %83 : vector<16x32xf32> to vector<16x32xbf16>
    %cst_21 = arith.constant dense<0.000000e+00> : vector<16x64xf32>
    %87 = tpu.matmul %86, %85, %cst_21 {dimension_numbers = #tpu.dot_dimension_numbers<[1], [0], [0], [1], [0, 0, 1, 1], [], []>} : vector<16x32xbf16>, vector<32x64xbf16>, vector<16x64xf32> -> vector<16x64xf32>
    %88 = arith.addf %66, %87 : vector<16x64xf32>
    %89 = vector.extract_strided_slice %29 {offsets = [0, 32], sizes = [16, 32], strides = [1, 1]} : vector<16x64xbf16> to vector<16x32xbf16>
    %90 = vector.extract_strided_slice %30 {offsets = [0, 32], sizes = [16, 32], strides = [1, 1]} : vector<16x128xbf16> to vector<16x32xbf16>
    %91 = vector.extract_strided_slice %30 {offsets = [0, 96], sizes = [16, 32], strides = [1, 1]} : vector<16x128xbf16> to vector<16x32xbf16>
    %cst_22 = arith.constant dense<0.000000e+00> : vector<16x16xf32>
    %92 = tpu.matmul %89, %90, %cst_22 {dimension_numbers = #tpu.dot_dimension_numbers<[1], [1], [0], [0], [0, 0, 1, 0], [], []>} : vector<16x32xbf16>, vector<16x32xbf16>, vector<16x16xf32> -> vector<16x16xf32>
    %93 = arith.addf %92, %60 : vector<16x16xf32>
    %cst_23 = arith.constant dense<0xFF800000> : vector<16xf32>
    %94 = vector.multi_reduction <maximumf>, %93, %cst_23 [1] : vector<16x16xf32> to vector<16xf32>
    %95 = vector.shape_cast %94 : vector<16xf32> to vector<16x1xf32>
    %96 = vector.broadcast %95 : vector<16x1xf32> to vector<16x16xf32>
    %97 = arith.subf %93, %96 : vector<16x16xf32>
    %98 = math.exp %97 : vector<16x16xf32>
    %cst_24 = arith.constant dense<0.000000e+00> : vector<16xf32>
    %99 = vector.multi_reduction <add>, %98, %cst_24 [1] : vector<16x16xf32> to vector<16xf32>
    %100 = vector.shape_cast %99 : vector<16xf32> to vector<16x1xf32>
    %101 = tpu.reciprocal %100 : vector<16x1xf32> -> vector<16x1xf32>
    %102 = vector.broadcast %101 : vector<16x1xf32> to vector<16x16xf32>
    %103 = arith.mulf %98, %102 : vector<16x16xf32>
    %104 = arith.truncf %103 : vector<16x16xf32> to vector<16x16xbf16>
    %cst_25 = arith.constant dense<0.000000e+00> : vector<16x32xf32>
    %105 = tpu.matmul %104, %91, %cst_25 {dimension_numbers = #tpu.dot_dimension_numbers<[1], [0], [0], [1], [0, 0, 1, 1], [], []>} : vector<16x16xbf16>, vector<16x32xbf16>, vector<16x32xf32> -> vector<16x32xf32>
    %c32 = arith.constant 32 : index
    %c64_26 = arith.constant 64 : index
    %106 = vector.load %arg4[%c32, %c64_26] : memref<328x128xf32, #tpu.memory_space<vmem>>, vector<32x64xf32>
    %107 = arith.truncf %106 : vector<32x64xf32> to vector<32x64xbf16>
    %108 = arith.truncf %105 : vector<16x32xf32> to vector<16x32xbf16>
    %cst_27 = arith.constant dense<0.000000e+00> : vector<16x64xf32>
    %109 = tpu.matmul %108, %107, %cst_27 {dimension_numbers = #tpu.dot_dimension_numbers<[1], [0], [0], [1], [0, 0, 1, 1], [], []>} : vector<16x32xbf16>, vector<32x64xbf16>, vector<16x64xf32> -> vector<16x64xf32>
    %110 = arith.addf %88, %109 : vector<16x64xf32>
    %111 = vector.broadcast %13 : vector<1x64xf32> to vector<16x64xf32>
    %112 = arith.addf %110, %111 : vector<16x64xf32>
    %113 = arith.addf %112, %1 : vector<16x64xf32>
    %cst_28 = arith.constant dense<0.000000e+00> : vector<16xf32>
    %114 = vector.multi_reduction <add>, %113, %cst_28 [1] : vector<16x64xf32> to vector<16xf32>
    %115 = vector.shape_cast %114 : vector<16xf32> to vector<16x1xf32>
    %cst_29 = arith.constant 6.400000e+01 : f32
    %116 = vector.broadcast %cst_29 : f32 to vector<16x1xf32>
    %117 = arith.divf %115, %116 : vector<16x1xf32>
    %118 = vector.broadcast %117 : vector<16x1xf32> to vector<16x64xf32>
    %119 = arith.subf %113, %118 : vector<16x64xf32>
    %120 = arith.mulf %119, %119 : vector<16x64xf32>
    %cst_30 = arith.constant dense<0.000000e+00> : vector<16xf32>
    %121 = vector.multi_reduction <add>, %120, %cst_30 [1] : vector<16x64xf32> to vector<16xf32>
    %122 = vector.shape_cast %121 : vector<16xf32> to vector<16x1xf32>
    %cst_31 = arith.constant 6.400000e+01 : f32
    %123 = vector.broadcast %cst_31 : f32 to vector<16x1xf32>
    %124 = arith.divf %122, %123 : vector<16x1xf32>
    %125 = vector.broadcast %117 : vector<16x1xf32> to vector<16x64xf32>
    %126 = arith.subf %113, %125 : vector<16x64xf32>
    %cst_32 = arith.constant 9.99999974E-6 : f32
    %127 = vector.broadcast %cst_32 : f32 to vector<16x1xf32>
    %128 = arith.addf %124, %127 : vector<16x1xf32>
    %129 = math.rsqrt %128 : vector<16x1xf32>
    %130 = vector.broadcast %129 : vector<16x1xf32> to vector<16x64xf32>
    %131 = arith.mulf %126, %130 : vector<16x64xf32>
    %132 = vector.broadcast %17 : vector<1x64xf32> to vector<16x64xf32>
    %133 = arith.mulf %131, %132 : vector<16x64xf32>
    %134 = vector.broadcast %19 : vector<1x64xf32> to vector<16x64xf32>
    %135 = arith.addf %133, %134 : vector<16x64xf32>
    %136 = vector.broadcast %65 : vector<16x1xf32> to vector<16x64xf32>
    %137 = arith.mulf %135, %136 : vector<16x64xf32>
    %138 = arith.truncf %137 : vector<16x64xf32> to vector<16x64xbf16>
    %cst_33 = arith.constant dense<0.000000e+00> : vector<16x128xf32>
    %139 = tpu.matmul %138, %8, %cst_33 {dimension_numbers = #tpu.dot_dimension_numbers<[1], [0], [0], [1], [0, 0, 1, 1], [], []>} : vector<16x64xbf16>, vector<64x128xbf16>, vector<16x128xf32> -> vector<16x128xf32>
    %140 = vector.broadcast %15 : vector<1x128xf32> to vector<16x128xf32>
    %141 = arith.addf %139, %140 : vector<16x128xf32>
    %cst_34 = arith.constant 0.000000e+00 : f32
    %142 = vector.broadcast %cst_34 : f32 to vector<16x128xf32>
    %143 = arith.maximumf %141, %142 : vector<16x128xf32>
    %144 = arith.truncf %143 : vector<16x128xf32> to vector<16x128xbf16>
    %cst_35 = arith.constant dense<0.000000e+00> : vector<16x64xf32>
    %145 = tpu.matmul %144, %10, %cst_35 {dimension_numbers = #tpu.dot_dimension_numbers<[1], [0], [0], [1], [0, 0, 1, 1], [], []>} : vector<16x128xbf16>, vector<128x64xbf16>, vector<16x64xf32> -> vector<16x64xf32>
    %146 = vector.broadcast %16 : vector<1x64xf32> to vector<16x64xf32>
    %147 = arith.addf %145, %146 : vector<16x64xf32>
    %148 = arith.addf %147, %137 : vector<16x64xf32>
    %cst_36 = arith.constant dense<0.000000e+00> : vector<16xf32>
    %149 = vector.multi_reduction <add>, %148, %cst_36 [1] : vector<16x64xf32> to vector<16xf32>
    %150 = vector.shape_cast %149 : vector<16xf32> to vector<16x1xf32>
    %cst_37 = arith.constant 6.400000e+01 : f32
    %151 = vector.broadcast %cst_37 : f32 to vector<16x1xf32>
    %152 = arith.divf %150, %151 : vector<16x1xf32>
    %153 = vector.broadcast %152 : vector<16x1xf32> to vector<16x64xf32>
    %154 = arith.subf %148, %153 : vector<16x64xf32>
    %155 = arith.mulf %154, %154 : vector<16x64xf32>
    %cst_38 = arith.constant dense<0.000000e+00> : vector<16xf32>
    %156 = vector.multi_reduction <add>, %155, %cst_38 [1] : vector<16x64xf32> to vector<16xf32>
    %157 = vector.shape_cast %156 : vector<16xf32> to vector<16x1xf32>
    %cst_39 = arith.constant 6.400000e+01 : f32
    %158 = vector.broadcast %cst_39 : f32 to vector<16x1xf32>
    %159 = arith.divf %157, %158 : vector<16x1xf32>
    %160 = vector.broadcast %152 : vector<16x1xf32> to vector<16x64xf32>
    %161 = arith.subf %148, %160 : vector<16x64xf32>
    %cst_40 = arith.constant 9.99999974E-6 : f32
    %162 = vector.broadcast %cst_40 : f32 to vector<16x1xf32>
    %163 = arith.addf %159, %162 : vector<16x1xf32>
    %164 = math.rsqrt %163 : vector<16x1xf32>
    %165 = vector.broadcast %164 : vector<16x1xf32> to vector<16x64xf32>
    %166 = arith.mulf %161, %165 : vector<16x64xf32>
    %167 = vector.broadcast %18 : vector<1x64xf32> to vector<16x64xf32>
    %168 = arith.mulf %166, %167 : vector<16x64xf32>
    %169 = vector.broadcast %20 : vector<1x64xf32> to vector<16x64xf32>
    %170 = arith.addf %168, %169 : vector<16x64xf32>
    %171 = vector.broadcast %65 : vector<16x1xf32> to vector<16x64xf32>
    %172 = arith.mulf %170, %171 : vector<16x64xf32>
    %c0_41 = arith.constant 0 : index
    %c0_42 = arith.constant 0 : index
    %173 = vector.load %arg5[%c0_41, %c0_42] : memref<16x64xf32, #tpu.memory_space<vmem>>, vector<16x64xf32>
    tpu.vector_store %arg5[%c0_41, %c0_42], %172 {strides = array<i32>} : memref<16x64xf32, #tpu.memory_space<vmem>>, vector<16x64xf32>,
    return
  }
  func.func @transform_0(%arg0: i32, %arg1: memref<3xi32, #tpu.memory_space<smem>>) -> (i32, i32) {
    %c0_i32 = arith.constant 0 : i32
    %c0_i32_0 = arith.constant 0 : i32
    return %arg0, %c0_i32 : i32, i32
  }
  func.func @transform_1(%arg0: i32, %arg1: memref<3xi32, #tpu.memory_space<smem>>) -> (i32, i32) {
    %c0_i32 = arith.constant 0 : i32
    %c0_i32_0 = arith.constant 0 : i32
    %c0_i32_1 = arith.constant 0 : i32
    return %c0_i32, %c0_i32_0 : i32, i32
  }
  func.func @transform_2(%arg0: i32, %arg1: memref<3xi32, #tpu.memory_space<smem>>) -> (i32, i32) {
    %c0_i32 = arith.constant 0 : i32
    %c0_i32_0 = arith.constant 0 : i32
    %c0_i32_1 = arith.constant 0 : i32
    return %c0_i32, %c0_i32_0 : i32, i32
  }
  func.func @transform_3(%arg0: i32, %arg1: memref<3xi32, #tpu.memory_space<smem>>) -> (i32, i32) {
    %c0_i32 = arith.constant 0 : i32
    %c0_i32_0 = arith.constant 0 : i32
    return %arg0, %c0_i32 : i32, i32
  }
}

</mosaic_0001>

<bundles_post_ra>
// kernel: cross_attention_cell.1
= control target key start
LH: loop header
LB: loop body
LE: loop exit
PB: predicated region body
PF: predicated region fallthrough
CT: control target
= control target key end

     0   :  { %s741_s18 = smov [#allocation3]   ;;  %s940_s0 = inlined_call_operand.vmem [shape: s32[3], index: 0, kind: input, shape index: {}]   ;;  %s941_s1 = inlined_call_operand.vmem [shape: f32[16,64], index: 1, kind: input, shape index: {}]   ;;  %s942_s2 = inlined_call_operand.vmem [shape: f32[16,64], index: 2, kind: input, shape index: {}]   ;;  %s943_s3 = inlined_call_operand.hbm [shape: f32[328,128], index: 3, kind: input, shape index: {}]   ;;  %s944_s4 = inlined_call_operand.hbm [shape: f32[16,64], index: 4, kind: output, shape index: {}]  }
   0x1   :  { %s10_s17 = sshll.u32 %s940_s0, 4  ;;  %s11_s17 = int_to_ptr.vmem [resolvable:$true] %s10_s17 }
   0x2   :  { %13 = dma.vmem_to_smem %s11_s17, 16, %s741_s18, [#allocation2] }
   0x3   :  { %735 = dma.done.wait [#allocation2], 16 }
   0x4   :  { %736 = vsyncadd [#allocation2], 4294967280 }
   0x5   :  { %16 = sfence }
   0x6   :  { %17 = vsyncpa [#allocation5], 0 }
   0x7   :  { %18 = vsyncpa [#allocation6], 0  ;;  %s27_s21 = sshll.u32 %s943_s3, 4  ;;  %s742_s22 = smov [#allocation4]   ;;  %s28_s21 = int_to_ptr.hbm [resolvable:$true] %s27_s21 }
   0x8   :  { %s29_s23 = sshll.u32 %s742_s22, 4  ;;  %s743_s24 = smov 128   ;;  %s30_s23 = int_to_ptr.vmem [resolvable:$true] %s29_s23 }
   0x9   :  { %s744_s25 = smov 8  }
   0xa   :  { %35 = dma.hbm_to_vmem [thread:$0]  %s28_s21, 5248, %s30_s23, [#allocation5], %s743_s24, %s743_s24, %s744_s25  }
   0xb   :  { %737 = dma.done.wait [#allocation5], 5248  }
   0xc   :  { %738 = vsyncadd [#allocation5], 4294962048  ;;  %v64_v0 = vld [vmem:[#allocation4 + $0x70] sm:$0xff]  ;;  %v65_v1 = vld [vmem:[#allocation4 + $0x78] sm:$0xff]  ;;  %vm109_vm0 = vcmask 523264   ;;  %vm197_vm1 = vcmask 261120   ;;  %v150_v55 = vlaneseq }
   0xd   :  { %v62_v2 = vld [vmem:[#allocation4 + $0x60] sm:$0xff]  ;;  %v69_v3 = vpack.c.bf16 %v65_v1, %v64_v0  ;;  %v63_v4 = vld [vmem:[#allocation4 + $0x68] sm:$0xff]  ;;  %v52_v5 = vld [vmem:[#allocation4 + $0x30] sm:$0xff]  ;;  %s626_s6 = sld [smem:[#allocation3 + $0x1]]  ;;  %v747_v60 = vmov 0   ;;  %vm218_vm9 = vcmask 130048  }
   0xe   :  { %v53_v6 = vld [vmem:[#allocation4 + $0x38] sm:$0xff]  ;;  %v50_v8 = vld [vmem:[#allocation4 + $0x20] sm:$0xff]  ;;  %v68_v9 = vpack.c.bf16 %v63_v4, %v62_v2  ;;  %v51_v10 = vld [vmem:[#allocation4 + $0x28] sm:$0xff]  ;;  %s627_s7 = sld [smem:[#allocation3 + $0x2]]  ;;  %v832_v56 = vshrl.u32 %v150_v55, 7  ;;  %v157_v57 = vand.u32 127, %v150_v55 }
   0xf   :  { %v787_v7 = vpack.c.bf16 %v53_v6, %v52_v5  ;;  %136 = vmatpush.bf16.msra.mxu1 %v69_v3  ;;  %v60_v11 = vld [vmem:[#allocation4 + $0x50] sm:$0xff]  ;;  %v61_v12 = vld [vmem:[#allocation4 + $0x58] sm:$0xff]  ;;  %v790_v13 = vpack.c.bf16 %v51_v10, %v50_v8  ;;  %v58_v17 = vld [vmem:[#allocation4 + $0x40] sm:$0xff]  ;;  %v748_v6 = vmov -1e+30   ;;  %s749_s8 = smov 32  }
  0x10   :  { %v48_v14 = vld [vmem:[#allocation4 + $0x10] sm:$0xff]  ;;  %v49_v15 = vld [vmem:[#allocation4 + $0x18] sm:$0xff]  ;;  %v67_v16 = vpack.c.bf16 %v61_v12, %v60_v11  ;;  %v59_v18 = vld [vmem:[#allocation4 + $0x48] sm:$0xff]  ;;  %v841_v1 = vadd.s32 8, %v832_v56  ;;  %s752_s9 = smov [#allocation7]   ;;  %s611_s13 = sshll.u32 %s944_s4, 4  ;;  %s612_s13 = int_to_ptr.hbm [resolvable:$true] %s611_s13 }
  0x11   :  { %117 = vmatpush.bf16.msra.mxu0 %v787_v7  ;;  %v793_v19 = vpack.c.bf16 %v49_v15, %v48_v14  ;;  %v46_v20 = vld [vmem:[#allocation4] sm:$0xff]  ;;  %v47_v21 = vld [vmem:[#allocation4 + $0x8] sm:$0xff]  ;;  %v66_v22 = vpack.c.bf16 %v59_v18, %v58_v17  ;;  %s609_s10 = sshll.u32 %s752_s9, 4  ;;  %s610_s10 = int_to_ptr.vmem [resolvable:$true] %s609_s10 }
  0x12   :  { %v44_v23 = vld [vmem:[%s942_s2] sm:$0xff]  ;;  %v45_v24 = vld [vmem:[%s942_s2 + $0x8] sm:$0xff]  ;;  %v802_v25 = vpack.c.bf16 %v47_v21, %v46_v20  ;;  %s746_s2 = smov 96  }
  0x13   :  { %137 = vmatpush.bf16.msra.mxu1 %v68_v9  ;;  %v807_v26 = vld [vmem:[%s941_s1] sm:$0xff]  ;;  %v812_v27 = vld [vmem:[%s941_s1 + $0x8] sm:$0xff]  ;;  %v127_v28 = vpack.c.bf16 %v45_v24, %v44_v23  ;;  %s745_s1 = smov 64   ;;  %v159_v58 = vstv %s626_s6 }
  0x14   :  { %v107_v29 = vpack.c.bf16 %v812_v27, %v807_v26  ;;  %v819_v30 = vld [vmem:[#allocation4 + $0x140] sm:$0xff]  ;;  %v834_v59 = vstv %s627_s7  ;;  %vm160_vm2 = vcmp.ge.s32.totalorder %v832_v56, %v159_v58  ;;  %vm164_vm3 = vcmp.ge.s32.totalorder %v157_v57, %v159_v58 }
  0x15   :  { %118 = vmatpush.bf16.msra.mxu0 %v790_v13  ;;  %v128_v32 = vperm.slane %v819_v30, 1  ;;  %v823_v35 = vperm.slane %v819_v30, 0  ;;  %vm168_vm4 = vcmp.ge.s32.totalorder %v832_v56, %v834_v59  ;;  %vm174_vm5 = vcmp.ge.s32.totalorder %v157_v57, %v834_v59 }
  0x16   :  { %v162_v61 = vsel %vm160_vm2, 1, %v747_v60  ;;  %v165_v62 = vsel %vm164_vm3, 1, %v747_v60  ;;  %v170_v63 = vsel %vm168_vm4, 1, %v747_v60  ;;  %v175_v0 = vsel %vm174_vm5, 1, %v747_v60 }
  0x17   :  { %138 = vmatpush.bf16.msra.mxu1 %v67_v16  ;;  %v172_v2 = vadd.s32 %v170_v63, %v162_v61  ;;  %v176_v3 = vadd.s32 %v175_v0, %v165_v62  ;;  %vm161_vm6 = vcmp.ge.s32.totalorder %v841_v1, %v159_v58  ;;  %vm169_vm7 = vcmp.ge.s32.totalorder %v841_v1, %v834_v59 }
  0x18   :  { %v163_v4 = vsel %vm161_vm6, 1, %v747_v60  ;;  %v171_v5 = vsel %vm169_vm7, 1, %v747_v60 }
  0x19   :  { %119 = vmatpush.bf16.msra.mxu0 %v793_v19  ;;  %vm177_vm8 = vcmp.eq.s32.totalorder %v172_v2, %v176_v3  ;;  %v173_v9 = vadd.s32 %v171_v5, %v163_v4 }
  0x1a   :  { %v846_v8 = vsel %vm177_vm8, 0.0, %v748_v6 }
  0x1b   :  { %139 = vmatpush.bf16.msra.mxu1 %v66_v22  ;;  %vm178_vm10 = vcmp.eq.s32.totalorder %v173_v9, %v176_v3 }
  0x1c   :  { %v850_v14 = vsel %vm178_vm10, 0.0, %v748_v6 }
  0x1d   :  { %120 = vmatpush.bf16.msra.mxu0 %v802_v25 }
  0x1e   :  { %625 = vmatmul.msk.bf16.vlgmr.msra.gmra.mxu1 %vm109_vm0, %v127_v28 }
  0x20   :  { %624 = vmatmul.msk.bf16.vlgmr.msra.gmra.mxu0 %vm109_vm0, %v107_v29 }
  0x9b   :  { %v141_v31 = vpop.f32.mrf.mxu1 }
  0x9c   :  { %v142_v34 = vadd.f32 %v141_v31, %v128_v32 }
  0x9d   :  { %v122_v33 = vpop.f32.mrf.mxu0 }
  0x9e   :  { %v148_v37 = vpack.c.bf16 %v142_v34, %v142_v34  ;;  %v123_v40 = vadd.f32 %v122_v33, %v823_v35 }
  0xa0   :  { %v194_v43 = vunpack.c.l.b16 %v148_v37  ;;  %v146_v45 = vpack.c.bf16 %v123_v40, %v123_v40 }
  0xa2   :  { %v189_v49 = vunpack.c.l.b16 %v146_v45 }
  0xa3   :  { %v143_v36 = vpop.f32.mrf.mxu1 }
  0xa4   :  { %v144_v38 = vadd.f32 %v143_v36, %v128_v32 }
  0xa5   :  { %v124_v39 = vpop.f32.mrf.mxu0 }
  0xa6   :  { %v149_v41 = vpack.c.bf16 %v144_v38, %v144_v38  ;;  %v125_v42 = vadd.f32 %v124_v39, %v823_v35 }
  0xa8   :  { %v195_v44 = vunpack.c.l.b16 %v149_v41  ;;  %v147_v47 = vpack.c.bf16 %v125_v42, %v125_v42 }
  0xaa   :  { %v196_v46 = vpack.c.b16 %v195_v44, %v194_v43  ;;  %v190_v50 = vunpack.c.l.b16 %v147_v47 }
  0xac   :  { %268 = vrot.lane.b32.xlu2 %v196_v46, %s745_s1  ;;  %v202_v48 = vsel %vm197_vm1, %v196_v46, 0  ;;  %v191_v51 = vpack.c.b16 %v190_v50, %v189_v49 }
  0xad   :  { %211 = vmatpush.bf16.xpose.msrb.mxu0 %v202_v48 }
  0xb4   :  { %297 = vrot.lane.b32.xlu2 %v196_v46, %s746_s2  ;;  %630 = vmatmul.msk.bf16.vlgmr.msrb.gmra.mxu0 %vm197_vm1, %v191_v51 }
 0x106   :  { %v269_v52 = vpop.permute.xlu2 %268 }
 0x107   :  { %281 = vmatpush.bf16.msra.mxu3 %v269_v52 }
 0x10e   :  { %v298_v53 = vpop.permute.xlu2 %297 }
 0x10f   :  { %v303_v54 = vsel %vm197_vm1, %v298_v53, 0 }
 0x110   :  { %312 = vmatpush.bf16.xpose.msrb.mxu3 %v303_v54 }
 0x131   :  { %v213_v10 = vpop.f32.mrf.mxu0 }
 0x132   :  { %v214_v11 = vadd.f32 %v213_v10, %v846_v8 }
 0x134   :  { %v219_v12 = vsel %vm218_vm9, %v214_v11, -inf }
 0x135   :  { %220 = vmax.xlane.f32.xlu0 %v219_v12 }
 0x139   :  { %v215_v15 = vpop.f32.mrf.mxu0 }
 0x13a   :  { %v216_v16 = vadd.f32 %v215_v15, %v850_v14 }
 0x13c   :  { %v222_v17 = vsel %vm218_vm9, %v216_v16, -inf }
 0x13d   :  { %223 = vmax.xlane.f32.xlu0 %v222_v17 }
 0x151   :  { %295 = vrot.lane.b32.xlu0 %v191_v51, %s746_s2 }
 0x159   :  { %368 = vrot.lane.b32.xlu0 %v196_v46, %s749_s8 }
 0x161   :  { %418 = vrot.lane.b32.xlu0 %v793_v19, %s745_s1 }
 0x169   :  { %391 = vrot.lane.b32.xlu0 %v790_v13, %s745_s1 }
 0x171   :  { %440 = vrot.lane.b32.xlu0 %v823_v35, %s745_s1 }
 0x1a8   :  { %v221_v18 = vpop.xlane.xlu0 %220 }
 0x1a9   :  { %v225_v20 = vsub.f32 %v214_v11, %v221_v18 }
 0x1ab   :  { %v227_v21 = vmul.f32 1.442695, %v225_v20 }
 0x1ad   :  { %649 = vpow2.f32 %v227_v21 }
 0x1b0   :  { %v224_v22 = vpop.xlane.xlu0 %223 }
 0x1b1   :  { %v226_v23 = vsub.f32 %v216_v16, %v224_v22 }
 0x1b3   :  { %v650_v24 = vpop.eup %649  ;;  %v229_v28 = vmul.f32 1.442695, %v226_v23 }
 0x1b4   :  { %v231_v29 = vsel %vm218_vm9, %v650_v24, 0.0 }
 0x1b5   :  { %651 = vpow2.f32 %v229_v28  ;;  %232 = vadd.xlane.f32.xlu1 %v231_v29 }
 0x1bb   :  { %v652_v31 = vpop.eup %651 }
 0x1bc   :  { %v234_v19 = vsel %vm218_vm9, %v652_v31, 0.0 }
 0x1bd   :  { %235 = vadd.xlane.f32.xlu1 %v234_v19 }
 0x1c3   :  { %v296_v13 = vpop.permute.xlu0 %295 }
 0x1cb   :  { %v369_v32 = vpop.permute.xlu0 %368 }
 0x1cc   :  { %381 = vmatpush.bf16.msra.mxu2 %v369_v32 }
 0x1d3   :  { %v419_v6 = vpop.permute.xlu0 %418 }
 0x1d4   :  { %431 = vmatpush.bf16.msrb.mxu1 %v419_v6 }
 0x228   :  { %v233_v33 = vpop.xlane.xlu1 %232 }
 0x229   :  { %653 = vrcp.f32 %v233_v33  ;;  %v248_v42 = vand.u32 2147483648, %v233_v33  ;;  %vm242_vm12 = vweird.f32 %v233_v33  ;;  %v246_v43 = vand.u32 2147483647, %v233_v33 }
 0x22b   :  { %v249_v49 = vor.u32 1.1754944e-38, %v248_v42  ;;  %vm247_vm15 = vcmp.eq.f32.partialorder %v246_v43, 8.507059e+37 }
 0x22f   :  { %v654_v34 = vpop.eup %653 }
 0x230   :  { %v238_v35 = vmul.f32 %v654_v34, %v233_v33  ;;  %v236_v36 = vpop.xlane.xlu1 %235  ;;  %vm243_vm11 = vweird.f32 %v654_v34 }
 0x231   :  { %655 = vrcp.f32 %v236_v36  ;;  %vm244_vm13 = vmor %vm242_vm12, %vm243_vm11  ;;  %v262_v45 = vand.u32 2147483648, %v236_v36  ;;  %v260_v47 = vand.u32 2147483647, %v236_v36  ;;  %vm256_vm2 = vweird.f32 %v236_v36 }
 0x232   :  { %v239_v37 = vsub.f32 1.0, %v238_v35 }
 0x233   :  { %v263_v51 = vor.u32 1.1754944e-38, %v262_v45  ;;  %vm261_vm4 = vcmp.eq.f32.partialorder %v260_v47, 8.507059e+37  ;;  %v392_v47 = vpop.permute.xlu0 %391 }
 0x234   :  { %v240_v38 = vmul.f32 %v654_v34, %v239_v37 }
 0x236   :  { %v241_v40 = vadd.f32 %v654_v34, %v240_v38 }
 0x237   :  { %v656_v39 = vpop.eup %655 }
 0x238   :  { %v252_v41 = vmul.f32 %v656_v39, %v236_v36  ;;  %vm257_vm14 = vweird.f32 %v656_v39  ;;  %v245_v48 = vsel %vm244_vm13, %v654_v34, %v241_v40 }
 0x239   :  { %vm258_vm3 = vmor %vm256_vm2, %vm257_vm14  ;;  %v250_v52 = vsel %vm247_vm15, %v249_v49, %v245_v48 }
 0x23a   :  { %v253_v44 = vsub.f32 1.0, %v252_v41  ;;  %v265_v55 = vmul.f32 %v650_v24, %v250_v52 }
 0x23c   :  { %v254_v46 = vmul.f32 %v656_v39, %v253_v44 }
 0x23e   :  { %v255_v50 = vadd.f32 %v656_v39, %v254_v46 }
 0x240   :  { %v259_v53 = vsel %vm258_vm3, %v656_v39, %v255_v50 }
 0x241   :  { %v264_v54 = vsel %vm261_vm4, %v263_v51, %v259_v53  ;;  %v441_v53 = vpop.permute.xlu0 %440 }
 0x242   :  { %v266_v57 = vmul.f32 %v652_v31, %v264_v54 }
 0x244   :  { %v267_v58 = vpack.c.bf16 %v266_v57, %v265_v55 }
 0x246   :  { %631 = vmatmul.msk.bf16.vlgmr.msra.gmra.mxu3 %vm218_vm9, %v267_v58 }
 0x256   :  { %632 = vmatmul.msk.bf16.vlgmr.msrb.gmra.mxu3 %vm197_vm1, %v296_v13 }
 0x2c9   :  { %v283_v60 = vpop.f32.mrf.mxu3 }
 0x2d1   :  { %v285_v61 = vpop.f32.mrf.mxu3 }
 0x2d2   :  { %v294_v62 = vpack.c.bf16 %v285_v61, %v283_v60 }
 0x2d9   :  { %v314_v63 = vpop.f32.mrf.mxu3 }
 0x2da   :  { %v315_v0 = vadd.f32 %v314_v63, %v846_v8 }
 0x2dc   :  { %v319_v2 = vsel %vm218_vm9, %v315_v0, -inf }
 0x2dd   :  { %320 = vmax.xlane.f32.xlu1 %v319_v2 }
 0x2e1   :  { %v316_v3 = vpop.f32.mrf.mxu3 }
 0x2e2   :  { %v317_v4 = vadd.f32 %v316_v3, %v850_v14  ;;  %v750_v3 = vmov 64.0  }
 0x2e4   :  { %v322_v5 = vsel %vm218_vm9, %v317_v4, -inf }
 0x2e5   :  { %323 = vmax.xlane.f32.xlu2 %v322_v5 }
 0x2fd   :  { %416 = vrot.lane.b32.xlu2 %v802_v25, %s745_s1 }
 0x350   :  { %v321_v9 = vpop.xlane.xlu1 %320 }
 0x351   :  { %v325_v10 = vsub.f32 %v315_v0, %v321_v9 }
 0x353   :  { %v327_v11 = vmul.f32 1.442695, %v325_v10 }
 0x355   :  { %657 = vpow2.f32 %v327_v11 }
 0x358   :  { %v324_v12 = vpop.xlane.xlu2 %323 }
 0x359   :  { %v326_v8 = vsub.f32 %v317_v4, %v324_v12 }
 0x35b   :  { %v658_v15 = vpop.eup %657  ;;  %v329_v16 = vmul.f32 1.442695, %v326_v8 }
 0x35c   :  { %v331_v17 = vsel %vm218_vm9, %v658_v15, 0.0 }
 0x35d   :  { %659 = vpow2.f32 %v329_v16  ;;  %332 = vadd.xlane.f32.xlu1 %v331_v17 }
 0x360   :  { %v417_v14 = vpop.permute.xlu2 %416 }
 0x361   :  { %432 = vmatpush.bf16.msrb.mxu1 %v417_v14 }
 0x363   :  { %v660_v18 = vpop.eup %659 }
 0x364   :  { %635 = vmatmul.msk.bf16.vlgmr.msrb.gmra.mxu1 %vm197_vm1, %v294_v62  ;;  %v334_v25 = vsel %vm218_vm9, %v660_v18, 0.0 }
 0x365   :  { %335 = vadd.xlane.f32.xlu1 %v334_v25 }
 0x37e   :  { %393 = vrot.lane.b32.xlu1 %v787_v7, %s745_s1 }
 0x3d0   :  { %v333_v20 = vpop.xlane.xlu1 %332 }
 0x3d1   :  { %661 = vrcp.f32 %v333_v20  ;;  %v348_v13 = vand.u32 2147483648, %v333_v20  ;;  %vm342_vm6 = vweird.f32 %v333_v20  ;;  %v346_v32 = vand.u32 2147483647, %v333_v20 }
 0x3d3   :  { %v349_v37 = vor.u32 1.1754944e-38, %v348_v13  ;;  %vm347_vm10 = vcmp.eq.f32.partialorder %v346_v32, 8.507059e+37 }
 0x3d7   :  { %v662_v21 = vpop.eup %661 }
 0x3d8   :  { %v338_v22 = vmul.f32 %v662_v21, %v333_v20  ;;  %v336_v23 = vpop.xlane.xlu1 %335  ;;  %vm343_vm5 = vweird.f32 %v662_v21  ;;  %v76_v20 = vld [vmem:[#allocation4 + $0xb0] sm:$0xff] }
 0x3d9   :  { %663 = vrcp.f32 %v336_v23  ;;  %vm344_vm7 = vmor %vm342_vm6, %vm343_vm5  ;;  %v362_v34 = vand.u32 2147483648, %v336_v23  ;;  %v360_v7 = vand.u32 2147483647, %v336_v23  ;;  %vm356_vm11 = vweird.f32 %v336_v23 }
 0x3da   :  { %v339_v24 = vsub.f32 1.0, %v338_v22  ;;  %665 = vrcp.f32 %v750_v3  ;;  %vm182_vm5 = vcmp.lt.s32.totalorder %v841_v1, %v834_v59  ;;  %vm181_vm6 = vcmp.lt.s32.totalorder %v832_v56, %v834_v59  ;;  %v86_v59 = vld [vmem:[#allocation4 + $0xe0] sm:$0xff] }
 0x3db   :  { %v363_v39 = vor.u32 1.1754944e-38, %v362_v34  ;;  %vm361_vm13 = vcmp.eq.f32.partialorder %v360_v7, 8.507059e+37  ;;  %v70_v34 = vld [vmem:[#allocation4 + $0x80] sm:$0xff] }
 0x3dc   :  { %v340_v28 = vmul.f32 %v662_v21, %v339_v24  ;;  %v75_v24 = vld [vmem:[#allocation4 + $0xa8] sm:$0xff] }
 0x3de   :  { %v341_v31 = vadd.f32 %v662_v21, %v340_v28 }
 0x3df   :  { %v664_v29 = vpop.eup %663 }
 0x3e0   :  { %v352_v19 = vmul.f32 %v664_v29, %v336_v23  ;;  %vm357_vm8 = vweird.f32 %v664_v29  ;;  %v345_v36 = vsel %vm344_vm7, %v662_v21, %v341_v31  ;;  %v666_v4 = vpop.eup %665  ;;  %v77_v21 = vld [vmem:[#allocation4 + $0xb8] sm:$0xff]  ;;  %v74_v23 = vld [vmem:[#allocation4 + $0xa0] sm:$0xff]  ;;  %v72_v31 = vld [vmem:[#allocation4 + $0x90] sm:$0xff] }
 0x3e1   :  { %vm358_vm12 = vmor %vm356_vm11, %vm357_vm8  ;;  %v350_v40 = vsel %vm347_vm10, %v349_v37, %v345_v36  ;;  %v434_v51 = vpop.f32.mrf.mxu1  ;;  %v454_v5 = vmul.f32 64.0, %v666_v4  ;;  %v81_v22 = vpack.c.bf16 %v77_v21, %v76_v20  ;;  %v80_v28 = vpack.c.bf16 %v75_v24, %v74_v23  ;;  %v87_v20 = vld [vmem:[#allocation4 + $0xe8] sm:$0xff]  ;;  %v85_v23 = vld [vmem:[#allocation4 + $0xd8] sm:$0xff] }
 0x3e2   :  { %v353_v33 = vsub.f32 1.0, %v352_v19  ;;  %v365_v43 = vmul.f32 %v658_v15, %v350_v40  ;;  %v73_v19 = vld [vmem:[#allocation4 + $0x98] sm:$0xff]  ;;  %v94_v40 = vld [vmem:[#allocation4 + $0x120] sm:$0xff]  ;;  %v100_v21 = vpack.c.bf16 %v87_v20, %v86_v59 }
 0x3e3   :  { %v455_v6 = vsub.f32 1.0, %v454_v5  ;;  %515 = vmatpush.bf16.msra.mxu3 %v81_v22  ;;  %v79_v32 = vpack.c.bf16 %v73_v19, %v72_v31  ;;  %v901_v5 = vperm.slane %v819_v30, 5  ;;  %v84_v22 = vld [vmem:[#allocation4 + $0xd0] sm:$0xff] }
 0x3e4   :  { %v354_v35 = vmul.f32 %v664_v29, %v353_v33  ;;  %v99_v24 = vpack.c.bf16 %v85_v23, %v84_v22 }
 0x3e5   :  { %v456_v9 = vmul.f32 %v666_v4, %v455_v6 }
 0x3e6   :  { %v355_v38 = vadd.f32 %v664_v29, %v354_v35  ;;  %v71_v35 = vld [vmem:[#allocation4 + $0x88] sm:$0xff] }
 0x3e7   :  { %v457_v10 = vadd.f32 %v666_v4, %v456_v9  ;;  %516 = vmatpush.bf16.msra.mxu3 %v80_v28  ;;  %v78_v7 = vpack.c.bf16 %v71_v35, %v70_v34  ;;  %v82_v28 = vld [vmem:[#allocation4 + $0xc0] sm:$0xff] }
 0x3e8   :  { %v359_v41 = vsel %vm358_vm12, %v664_v29, %v355_v38  ;;  %v96_v38 = vld [vmem:[#allocation4 + $0x130] sm:$0xff] }
 0x3e9   :  { %v364_v42 = vsel %vm361_vm13, %v363_v39, %v359_v41  ;;  %v436_v60 = vpop.f32.mrf.mxu1  ;;  %v97_v39 = vld [vmem:[#allocation4 + $0x138] sm:$0xff] }
 0x3ea   :  { %v366_v44 = vmul.f32 %v660_v18, %v364_v42  ;;  %v105_v41 = vpack.c.bf16 %v97_v39, %v96_v38  ;;  %v95_v42 = vld [vmem:[#allocation4 + $0x128] sm:$0xff] }
 0x3eb   :  { %517 = vmatpush.bf16.msra.mxu3 %v79_v32 }
 0x3ec   :  { %v367_v45 = vpack.c.bf16 %v366_v44, %v365_v43  ;;  %529 = vmatpush.bf16.msrb.mxu2 %v105_v41 }
 0x3ee   :  { %633 = vmatmul.msk.bf16.vlgmr.msra.gmra.mxu2 %vm218_vm9, %v367_v45 }
 0x3ef   :  { %518 = vmatpush.bf16.msra.mxu3 %v78_v7 }
 0x3f0   :  { %v394_v46 = vpop.permute.xlu1 %393 }
 0x3f1   :  { %406 = vmatpush.bf16.msra.mxu0 %v394_v46  ;;  %v104_v46 = vpack.c.bf16 %v95_v42, %v94_v40 }
 0x3f3   :  { %530 = vmatpush.bf16.msrb.mxu2 %v104_v46 }
 0x3f5   :  { %407 = vmatpush.bf16.msra.mxu0 %v392_v47  ;;  %v92_v47 = vld [vmem:[#allocation4 + $0x110] sm:$0xff] }
 0x471   :  { %v383_v48 = vpop.f32.mrf.mxu2 }
 0x479   :  { %v385_v49 = vpop.f32.mrf.mxu2 }
 0x47a   :  { %v388_v50 = vpack.c.bf16 %v385_v49, %v383_v48  ;;  %v93_v48 = vld [vmem:[#allocation4 + $0x118] sm:$0xff] }
 0x47c   :  { %634 = vmatmul.msk.bf16.vlgmr.msra.gmra.mxu0 %vm197_vm1, %v388_v50  ;;  %vm458_vm1 = vweird.f32 %v666_v4 }
 0x4f9   :  { %v409_v52 = vpop.f32.mrf.mxu0 }
 0x4fa   :  { %v435_v54 = vadd.f32 %v434_v51, %v409_v52  ;;  %v103_v51 = vpack.c.bf16 %v93_v48, %v92_v47  ;;  %v90_v52 = vld [vmem:[#allocation4 + $0x100] sm:$0xff] }
 0x4fc   :  { %v443_v55 = vadd.f32 %v441_v53, %v435_v54  ;;  %531 = vmatpush.bf16.msrb.mxu2 %v103_v51 }
 0x4fe   :  { %v445_v57 = vadd.f32 %v443_v55, %v807_v26  ;;  %v882_v26 = vsel %vm458_vm1, %v666_v4, %v457_v10 }
 0x500   :  { %v447_v58 = vsel %vm109_vm0, %v445_v57, 0.0 }
 0x501   :  { %v411_v61 = vpop.f32.mrf.mxu0  ;;  %448 = vadd.xlane.f32.xlu1 %v447_v58 }
 0x502   :  { %v437_v62 = vadd.f32 %v436_v60, %v411_v61 }
 0x504   :  { %v444_v63 = vadd.f32 %v441_v53, %v437_v62  ;;  %v91_v53 = vld [vmem:[#allocation4 + $0x108] sm:$0xff] }
 0x505   :  { %v102_v60 = vpack.c.bf16 %v91_v53, %v90_v52 }
 0x506   :  { %v446_v0 = vadd.f32 %v444_v63, %v812_v27 }
 0x507   :  { %532 = vmatpush.bf16.msrb.mxu2 %v102_v60 }
 0x508   :  { %v450_v2 = vsel %vm109_vm0, %v446_v0, 0.0 }
 0x509   :  { %451 = vadd.xlane.f32.xlu0 %v450_v2 }
 0x574   :  { %v449_v11 = vpop.xlane.xlu1 %448 }
 0x575   :  { %v460_v12 = vmul.f32 %v882_v26, %v449_v11 }
 0x577   :  { %v885_v8 = vsub.f32 %v445_v57, %v460_v12 }
 0x579   :  { %v464_v27 = vmul.f32 %v885_v8, %v885_v8 }
 0x57b   :  { %v466_v15 = vsel %vm109_vm0, %v464_v27, 0.0 }
 0x57c   :  { %v452_v16 = vpop.xlane.xlu0 %451  ;;  %467 = vadd.xlane.f32.xlu2 %v466_v15 }
 0x57d   :  { %v461_v17 = vmul.f32 %v882_v26, %v452_v16 }
 0x57f   :  { %v891_v14 = vsub.f32 %v446_v0, %v461_v17  ;;  %v498_v0 = vperm.slane %v819_v30, 4 }
 0x581   :  { %v465_v18 = vmul.f32 %v891_v14, %v891_v14 }
 0x583   :  { %v469_v25 = vsel %vm109_vm0, %v465_v18, 0.0 }
 0x584   :  { %470 = vadd.xlane.f32.xlu1 %v469_v25  ;;  %v89_v25 = vld [vmem:[#allocation4 + $0xf8] sm:$0xff] }
 0x5ef   :  { %v468_v29 = vpop.xlane.xlu2 %467 }
 0x5f0   :  { %v472_v13 = vmul.f32 %v468_v29, %v882_v26  ;;  %v83_v29 = vld [vmem:[#allocation4 + $0xc8] sm:$0xff] }
 0x5f1   :  { %v98_v31 = vpack.c.bf16 %v83_v29, %v82_v28 }
 0x5f2   :  { %v474_v33 = vadd.f32 1e-05, %v472_v13  ;;  %v507_v13 = vperm.slane %v819_v30, 2 }
 0x5f4   :  { %667 = vrsqrt.f32 %v474_v33  ;;  %vm482_vm14 = vweird.f32 %v474_v33 }
 0x5f7   :  { %v471_v36 = vpop.xlane.xlu1 %470 }
 0x5f8   :  { %v473_v37 = vmul.f32 %v471_v36, %v882_v26 }
 0x5fa   :  { %v668_v43 = vpop.eup %667  ;;  %v475_v44 = vadd.f32 1e-05, %v473_v37  ;;  %v528_v37 = vperm.slane %v819_v30, 3 }
 0x5fb   :  { %v477_v45 = vmul.f32 %v668_v43, %v474_v33  ;;  %vm483_vm9 = vweird.f32 %v668_v43 }
 0x5fc   :  { %669 = vrsqrt.f32 %v475_v44  ;;  %vm484_vm15 = vmor %vm482_vm14, %vm483_vm9  ;;  %vm492_vm3 = vweird.f32 %v475_v44 }
 0x5fd   :  { %v478_v49 = vmul.f32 %v668_v43, %v477_v45 }
 0x5ff   :  { %v479_v50 = vmul.f32 0.5, %v478_v49 }
 0x601   :  { %v480_v54 = vsub.f32 1.5, %v479_v50 }
 0x602   :  { %v670_v55 = vpop.eup %669 }
 0x603   :  { %v481_v57 = vmul.f32 %v668_v43, %v480_v54  ;;  %v487_v58 = vmul.f32 %v670_v55, %v475_v44  ;;  %vm493_vm2 = vweird.f32 %v670_v55 }
 0x604   :  { %vm494_vm4 = vmor %vm492_vm3, %vm493_vm2 }
 0x605   :  { %v485_v61 = vsel %vm484_vm15, %v668_v43, %v481_v57  ;;  %v488_v62 = vmul.f32 %v670_v55, %v487_v58 }
 0x606   :  { %v496_v2 = vmul.f32 %v485_v61, %v885_v8  ;;  %v751_v8 = vmov 0.0  }
 0x607   :  { %v489_v63 = vmul.f32 0.5, %v488_v62  ;;  %v909_v27 = vsel %vm181_vm6, 1.0, %v751_v8  ;;  %v911_v15 = vsel %vm182_vm5, 1.0, %v751_v8 }
 0x608   :  { %v499_v6 = vmul.f32 %v498_v0, %v496_v2 }
 0x609   :  { %v490_v3 = vsub.f32 1.5, %v489_v63 }
 0x60a   :  { %v502_v11 = vadd.f32 %v901_v5, %v499_v6 }
 0x60b   :  { %v491_v4 = vmul.f32 %v670_v55, %v490_v3 }
 0x60c   :  { %v504_v17 = vmul.f32 %v909_v27, %v502_v11 }
 0x60d   :  { %v495_v9 = vsel %vm494_vm4, %v670_v55, %v491_v4 }
 0x60e   :  { %v497_v10 = vmul.f32 %v495_v9, %v891_v14  ;;  %v88_v14 = vld [vmem:[#allocation4 + $0xf0] sm:$0xff] }
 0x60f   :  { %v101_v56 = vpack.c.bf16 %v89_v25, %v88_v14 }
 0x610   :  { %v500_v12 = vmul.f32 %v498_v0, %v497_v10 }
 0x611   :  { %533 = vmatpush.bf16.msrb.mxu2 %v101_v56 }
 0x612   :  { %v503_v16 = vadd.f32 %v901_v5, %v500_v12 }
 0x614   :  { %v505_v18 = vmul.f32 %v911_v15, %v503_v16 }
 0x615   :  { %534 = vmatpush.bf16.msrb.mxu2 %v100_v21 }
 0x616   :  { %v506_v1 = vpack.c.bf16 %v505_v18, %v504_v17 }
 0x618   :  { %636 = vmatmul.msk.bf16.vlgmr.msra.gmra.mxu3 %vm109_vm0, %v506_v1 }
 0x619   :  { %535 = vmatpush.bf16.msrb.mxu2 %v99_v24 }
 0x61d   :  { %536 = vmatpush.bf16.msrb.mxu2 %v98_v31 }
 0x69b   :  { %v520_v19 = vpop.f32.mrf.mxu3 }
 0x69c   :  { %v521_v32 = vadd.f32 %v520_v19, %v507_v13 }
 0x69e   :  { %v525_v35 = vmax.f32 %v521_v32, 0.0 }
 0x6a3   :  { %v522_v33 = vpop.f32.mrf.mxu3 }
 0x6a4   :  { %v523_v34 = vadd.f32 %v522_v33, %v507_v13 }
 0x6a6   :  { %v526_v7 = vmax.f32 %v523_v34, 0.0 }
 0x6a8   :  { %v527_v36 = vpack.c.bf16 %v526_v7, %v525_v35 }
 0x6aa   :  { %537 = vmatmul.bf16.vlgmr.msrb.gmra.mxu2 %v527_v36 }
 0x72d   :  { %v538_v38 = vpop.f32.mrf.mxu2 }
 0x72e   :  { %v539_v39 = vadd.f32 %v538_v38, %v528_v37 }
 0x730   :  { %v543_v40 = vadd.f32 %v539_v39, %v504_v17 }
 0x732   :  { %v545_v41 = vsel %vm109_vm0, %v543_v40, 0.0 }
 0x733   :  { %546 = vadd.xlane.f32.xlu0 %v545_v41 }
 0x735   :  { %v540_v42 = vpop.f32.mrf.mxu2 }
 0x736   :  { %v541_v43 = vadd.f32 %v540_v42, %v528_v37 }
 0x738   :  { %v544_v44 = vadd.f32 %v541_v43, %v505_v18 }
 0x73a   :  { %v548_v45 = vsel %vm109_vm0, %v544_v44, 0.0 }
 0x73b   :  { %549 = vadd.xlane.f32.xlu1 %v548_v45 }
 0x754   :  { %590 = vrot.lane.b32.xlu1 %v498_v0, %s745_s1 }
 0x7a6   :  { %v547_v46 = vpop.xlane.xlu0 %546 }
 0x7a7   :  { %v551_v47 = vmul.f32 %v547_v46, %v882_v26 }
 0x7a9   :  { %v553_v48 = vsub.f32 %v543_v40, %v551_v47 }
 0x7ab   :  { %v555_v49 = vmul.f32 %v553_v48, %v553_v48 }
 0x7ad   :  { %v557_v30 = vsel %vm109_vm0, %v555_v49, 0.0 }
 0x7ae   :  { %v550_v50 = vpop.xlane.xlu1 %549  ;;  %558 = vadd.xlane.f32.xlu0 %v557_v30 }
 0x7af   :  { %v552_v51 = vmul.f32 %v550_v50, %v882_v26 }
 0x7b1   :  { %v554_v52 = vsub.f32 %v544_v44, %v552_v51 }
 0x7b3   :  { %v556_v53 = vmul.f32 %v554_v52, %v554_v52 }
 0x7b5   :  { %v560_v54 = vsel %vm109_vm0, %v556_v53, 0.0 }
 0x7b6   :  { %561 = vadd.xlane.f32.xlu2 %v560_v54 }
 0x7c2   :  { %596 = vrot.lane.b32.xlu0 %v901_v5, %s745_s1 }
 0x7c6   :  { %v591_v11 = vpop.permute.xlu1 %590 }
 0x821   :  { %v559_v55 = vpop.xlane.xlu0 %558 }
 0x822   :  { %v563_v57 = vmul.f32 %v559_v55, %v882_v26 }
 0x824   :  { %v565_v58 = vadd.f32 1e-05, %v563_v57 }
 0x826   :  { %671 = vrsqrt.f32 %v565_v58  ;;  %vm573_vm8 = vweird.f32 %v565_v58 }
 0x829   :  { %v562_v60 = vpop.xlane.xlu2 %561 }
 0x82a   :  { %v564_v61 = vmul.f32 %v562_v60, %v882_v26 }
 0x82c   :  { %v672_v62 = vpop.eup %671  ;;  %v566_v63 = vadd.f32 1e-05, %v564_v61 }
 0x82d   :  { %v568_v0 = vmul.f32 %v672_v62, %v565_v58  ;;  %vm574_vm7 = vweird.f32 %v672_v62 }
 0x82e   :  { %673 = vrsqrt.f32 %v566_v63  ;;  %vm575_vm10 = vmor %vm573_vm8, %vm574_vm7  ;;  %vm583_vm12 = vweird.f32 %v566_v63 }
 0x82f   :  { %v569_v2 = vmul.f32 %v672_v62, %v568_v0 }
 0x831   :  { %v570_v3 = vmul.f32 0.5, %v569_v2 }
 0x833   :  { %v571_v4 = vsub.f32 1.5, %v570_v3 }
 0x834   :  { %v674_v6 = vpop.eup %673  ;;  %v597_v17 = vpop.permute.xlu0 %596 }
 0x835   :  { %v578_v9 = vmul.f32 %v674_v6, %v566_v63  ;;  %v572_v5 = vmul.f32 %v672_v62, %v571_v4  ;;  %vm584_vm11 = vweird.f32 %v674_v6 }
 0x836   :  { %vm585_vm13 = vmor %vm583_vm12, %vm584_vm11 }
 0x837   :  { %v579_v10 = vmul.f32 %v674_v6, %v578_v9  ;;  %v576_v12 = vsel %vm575_vm10, %v672_v62, %v572_v5 }
 0x838   :  { %v587_v8 = vmul.f32 %v576_v12, %v553_v48 }
 0x839   :  { %v580_v16 = vmul.f32 0.5, %v579_v10 }
 0x83a   :  { %v593_v26 = vmul.f32 %v591_v11, %v587_v8 }
 0x83b   :  { %v581_v18 = vsub.f32 1.5, %v580_v16 }
 0x83c   :  { %v599_v1 = vadd.f32 %v597_v17, %v593_v26 }
 0x83d   :  { %v582_v14 = vmul.f32 %v674_v6, %v581_v18 }
 0x83e   :  { %v601_v25 = vmul.f32 %v909_v27, %v599_v1 }
 0x83f   :  { %v586_v56 = vsel %vm585_vm13, %v674_v6, %v582_v14 }
 0x840   :  { %v588_v59 = vmul.f32 %v586_v56, %v554_v52  ;;  %603 = vst.msk [vmem:[#allocation7] sm:$0xff] %vm109_vm0, %v601_v25 }
 0x842   :  { %v594_v20 = vmul.f32 %v591_v11, %v588_v59 }
 0x844   :  { %v600_v21 = vadd.f32 %v597_v17, %v594_v20 }
 0x846   :  { %v602_v22 = vmul.f32 %v911_v15, %v600_v21 }
 0x848   :  { %604 = vst.msk [vmem:[#allocation7 + $0x8] sm:$0xff] %vm109_vm0, %v602_v22 }
 0x849   :  { %617 = dma.vmem_to_hbm [thread:$0]  %s610_s10, 256, %s612_s13, [#allocation6], %s743_s24, %s743_s24, %s744_s25  }
 0x84a   :  { %739 = dma.done.wait [#allocation6], 256  }
 0x84b   :  { %740 = vsyncadd [#allocation6], 4294967040 }
 0x84c   :  { %622 = vsyncpa [#allocation5], 1 }
 0x84d   :  { %623 = vsyncpa [#allocation6], 1 }

</bundles_post_ra>
